<compile_context>
chip_gen: v6e
topology: v6e:2x2x1
jax: 0.10.0
libtpu: 0.0.40
codegen_flags: <defaults>
</compile_context>

<pallas_src>
import functools

import jax
import jax.numpy as jnp
from jax.experimental import pallas as pl
from jax.experimental.pallas import tpu as pltpu


_LANE = 128      # lane width: all feature dims padded to multiples of this
_SUB = 16        # bf16 sublane packing granularity for batch padding / tiles
_MAX_TB = 2048   # upper bound on the batch tile


def _round_up(n, m):
    return ((n + m - 1) // m) * m


# --------------------------------------------------------------------------
# Kernel
# --------------------------------------------------------------------------
def _mlp_kernel(n_layers, *refs):
    """Fused MLP forward on one batch tile.

    refs = (x, w1, b1, ..., wL, bL, out).
    x is bf16 (TB, in_p); weights are bf16 (in_p, out_p); biases are f32
    (1, out_p); out is bf16 (TB, out_p).  All feature dims pre-padded to
    128-lane multiples, so every matmul is a clean MXU tile and every store
    is a lane-dense unmasked vst.
    """
    x_ref = refs[0]
    out_ref = refs[-1]
    param_refs = refs[1:-1]

    h = x_ref[...]                                # bf16 activation
    for layer in range(n_layers):
        w = param_refs[2 * layer][...]            # bf16, VMEM-resident
        b = param_refs[2 * layer + 1][...]        # f32 (1, out_p)
        # bf16 MXU inputs, f32 accumulation; bias-add in f32.
        y = jnp.dot(h, w, preferred_element_type=jnp.float32) + b
        if layer < n_layers - 1:
            # ReLU in f32, activation carried as bf16 (next layer's MXU input).
            # Dropout(0.1) is identity in eval mode.
            h = jnp.maximum(y, 0.0).astype(jnp.bfloat16)
        else:
            h = y
    out_ref[...] = h.astype(out_ref.dtype)


# --------------------------------------------------------------------------
# VMEM budgeting / tile selection
# --------------------------------------------------------------------------
def _vmem_request_cap():
    """~80% of per-core physical VMEM (generation-aware, with a safe fallback)."""
    cap = None
    try:
        info = pltpu.get_tpu_info()
        cap = int(getattr(info, "vmem_capacity_bytes", 0)) or None
    except Exception:
        cap = None
    if cap is None:
        cap = 64 * 1024 * 1024          # conservative: v7x per-TC physical VMEM
    return (cap * 4) // 5               # ~51 MiB on v7x, ~102 MiB on v5e/v6e


def _param_bytes(params):
    return sum(int(p.size) * p.dtype.itemsize for p in params)


def _row_bytes(padded):
    """Per-batch-row VMEM bytes: 2x-buffered bf16 x tile + 2x-buffered bf16 out
    tile + in-kernel activation temporaries (f32 y + bf16 h, with headroom)."""
    max_w = max(padded)
    return 2 * 2 * padded[0] + 2 * 2 * padded[-1] + 8 * max_w


def _vmem_bytes_needed(tb, padded, params):
    # Params get the default double-buffered pipeline even though they are
    # grid-invariant; count them twice, plus fixed slack for compiler scratch.
    return 2 * _param_bytes(params) + tb * _row_bytes(padded) + 2 * 1024 * 1024


def _choose_batch_tile(b_pad, padded, params):
    budget = _vmem_request_cap() - 2 * _param_bytes(params) - 4 * 1024 * 1024
    tb_cap = max(_SUB, (budget // _row_bytes(padded)) // _SUB * _SUB)
    tb = min(tb_cap, _MAX_TB, b_pad)
    if b_pad >= 2 * _SUB:
        # Keep >= 2 grid steps so both v7x TensorCores get a batch shard.
        tb = min(tb, _round_up((b_pad + 1) // 2, _SUB))
    return max(_SUB, (tb // _SUB) * _SUB)


# --------------------------------------------------------------------------
# Wrapper
# --------------------------------------------------------------------------
def _prepare_params(weights, biases):
    """One-time pad + cast of parameters (hoisted out of the hot path)."""
    d_in = weights[0].shape[0]
    out_size = weights[-1].shape[1]
    sizes = [d_in] + [w.shape[1] for w in weights]
    padded = tuple(_round_up(s, _LANE) for s in sizes)

    params = []
    for i, (w, b) in enumerate(zip(weights, biases)):
        w_p = (
            jnp.zeros((padded[i], padded[i + 1]), jnp.bfloat16)
            .at[: w.shape[0], : w.shape[1]]
            .set(jnp.asarray(w, jnp.bfloat16))
        )
        b_p = (
            jnp.zeros((1, padded[i + 1]), jnp.float32)
            .at[0, : b.shape[0]]
            .set(jnp.asarray(b, jnp.float32))
        )
        params.append(w_p)
        params.append(b_p)

    meta = dict(d_in=d_in, out_size=out_size, padded=padded,
                n_layers=len(weights))
    return meta, tuple(params)


def _forward_padded(meta, x, *params):
    B = x.shape[0]
    padded = meta["padded"]
    n_layers = meta["n_layers"]
    d_in = meta["d_in"]

    b_pad = _round_up(max(B, 1), _SUB)
    tb = _choose_batch_tile(b_pad, padded, params)
    b_total = _round_up(b_pad, tb)
    grid = b_total // tb

    # Pad + cast x once: bf16 halves the input HBM read / DMA bytes.
    x_p = (
        jnp.zeros((b_total, padded[0]), jnp.bfloat16)
        .at[:B, :d_in]
        .set(x.astype(jnp.bfloat16))
    )

    vmem = pltpu.MemorySpace.VMEM
    in_specs = [pl.BlockSpec((tb, padded[0]), lambda i: (i, 0), memory_space=vmem)]
    for p in params:
        # Grid-invariant: stays VMEM-resident across all batch tiles.
        in_specs.append(pl.BlockSpec(p.shape, lambda i: (0, 0), memory_space=vmem))
    out_spec = pl.BlockSpec((tb, padded[-1]), lambda i: (i, 0), memory_space=vmem)

    vmem_limit = min(max(_vmem_bytes_needed(tb, padded, params),
                         32 * 1024 * 1024),
                     _vmem_request_cap())

    out_padded = pl.pallas_call(
        functools.partial(_mlp_kernel, n_layers),
        out_shape=jax.ShapeDtypeStruct((b_total, padded[-1]), jnp.bfloat16),
        grid_spec=pltpu.PrefetchScalarGridSpec(
            num_scalar_prefetch=0,
            grid=(grid,),
            in_specs=in_specs,
            out_specs=out_spec,
        ),
        compiler_params=pltpu.CompilerParams(
            dimension_semantics=("parallel",),
            vmem_limit_bytes=int(vmem_limit),
        ),
    )(x_p, *params)

    return out_padded[:B, : meta["out_size"]].astype(jnp.float32)


def make_policy_forward(weights, biases):
    """Build a jitted forward fn with parameters padded/cast exactly once."""
    meta, padded_params = _prepare_params(weights, biases)
    fwd = jax.jit(functools.partial(_forward_padded, meta))

    def forward(x):
        return fwd(x, *padded_params)

    return forward


# --------------------------------------------------------------------------
# Init + reference + demo
# --------------------------------------------------------------------------
def init_params(key, input_size, hidden_sizes, output_size):
    """Deterministic parameter init (uniform ~ PyTorch Linear default range)."""
    sizes = [input_size] + list(hidden_sizes) + [output_size]
    weights, biases = [], []
    for i in range(len(sizes) - 1):
        fan_in, fan_out = sizes[i], sizes[i + 1]
        key, kw, kb = jax.random.split(key, 3)
        bound = 1.0 / (fan_in ** 0.5)
        # Stored as (in, out): transposed relative to torch's (out, in).
        w = jax.random.uniform(kw, (fan_in, fan_out), jnp.float32, -bound, bound)
        b = jax.random.uniform(kb, (fan_out,), jnp.float32, -bound, bound)
        weights.append(w)
        biases.append(b)
    return weights, biases


def reference_forward(x, weights, biases):
    h = x
    for i, (w, b) in enumerate(zip(weights, biases)):
        h = h @ w + b
        if i < len(weights) - 1:
            h = jnp.maximum(h, 0.0)
    return h


if __name__ == "__main__":
    # PolicyNetwork(input_size=16, hidden_sizes=[32, 32], output_size=8).
    input_size, hidden_sizes, output_size = 16, [32, 32], 8

    key = jax.random.PRNGKey(0)
    key, kx1, kx2 = jax.random.split(key, 3)
    weights, biases = init_params(key, input_size, hidden_sizes, output_size)
    forward = make_policy_forward(weights, biases)

    # Small batch (single grid step).
    x_small = jax.random.normal(kx1, (2, input_size), dtype=jnp.float32)
    out_small = jax.block_until_ready(forward(x_small))
    ref_small = reference_forward(x_small, weights, biases)
    assert out_small.shape == (2, output_size), out_small.shape
    assert jnp.allclose(out_small, ref_small, atol=3e-2, rtol=3e-2), (
        f"max abs err {jnp.max(jnp.abs(out_small - ref_small))}"
    )

    # Larger batch exercising the multi-step (>=2 tiles) grid path.
    x_big = jax.random.normal(kx2, (300, input_size), dtype=jnp.float32)
    out_big = jax.block_until_ready(forward(x_big))
    ref_big = reference_forward(x_big, weights, biases)
    assert out_big.shape == (300, output_size), out_big.shape
    assert jnp.allclose(out_big, ref_big, atol=3e-2, rtol=3e-2), (
        f"max abs err {jnp.max(jnp.abs(out_big - ref_big))}"
    )

    print("KERNEL_OK")
</pallas_src>

<mosaic_0001>
module attributes {stable_mosaic.version = 11 : i64} {
  func.func @_mlp_kernel(%arg0: i32, %arg1: memref<16x128xbf16, #tpu.memory_space<vmem>>, %arg2: memref<128x128xbf16, #tpu.memory_space<vmem>>, %arg3: memref<1x128xf32, #tpu.memory_space<vmem>>, %arg4: memref<128x128xbf16, #tpu.memory_space<vmem>>, %arg5: memref<1x128xf32, #tpu.memory_space<vmem>>, %arg6: memref<128x128xbf16, #tpu.memory_space<vmem>>, %arg7: memref<1x128xf32, #tpu.memory_space<vmem>>, %arg8: memref<16x128xbf16, #tpu.memory_space<vmem>>) attributes {dimension_semantics = [#tpu.dimension_semantics<parallel>], iteration_bounds = array<i64: 1>, scalar_prefetch = 0 : i64, scratch_operands = 0 : i64, tpu.core_type = #tpu.core_type<tc>, window_params = [{transform_indices = @transform_0, window_bounds = array<i64: 16, 128>}, {pipeline_mode = #tpu.pipeline_mode<synchronous>, transform_indices = @transform_1, window_bounds = array<i64: 128, 128>}, {pipeline_mode = #tpu.pipeline_mode<synchronous>, transform_indices = @transform_2, window_bounds = array<i64: 1, 128>}, {pipeline_mode = #tpu.pipeline_mode<synchronous>, transform_indices = @transform_3, window_bounds = array<i64: 128, 128>}, {pipeline_mode = #tpu.pipeline_mode<synchronous>, transform_indices = @transform_4, window_bounds = array<i64: 1, 128>}, {pipeline_mode = #tpu.pipeline_mode<synchronous>, transform_indices = @transform_5, window_bounds = array<i64: 128, 128>}, {pipeline_mode = #tpu.pipeline_mode<synchronous>, transform_indices = @transform_6, window_bounds = array<i64: 1, 128>}, {transform_indices = @transform_7, window_bounds = array<i64: 16, 128>}]} {
    %c0 = arith.constant 0 : index
    %c0_0 = arith.constant 0 : index
    %0 = vector.load %arg1[%c0, %c0_0] : memref<16x128xbf16, #tpu.memory_space<vmem>>, vector<16x128xbf16>
    %c0_1 = arith.constant 0 : index
    %c0_2 = arith.constant 0 : index
    %1 = vector.load %arg2[%c0_1, %c0_2] : memref<128x128xbf16, #tpu.memory_space<vmem>>, vector<128x128xbf16>
    %c0_3 = arith.constant 0 : index
    %c0_4 = arith.constant 0 : index
    %2 = vector.load %arg3[%c0_3, %c0_4] : memref<1x128xf32, #tpu.memory_space<vmem>>, vector<1x128xf32>
    %cst = arith.constant dense<0.000000e+00> : vector<16x128xf32>
    %3 = tpu.matmul %0, %1, %cst {dimension_numbers = #tpu.dot_dimension_numbers<[1], [0], [0], [1], [0, 0, 1, 1], [], []>} : vector<16x128xbf16>, vector<128x128xbf16>, vector<16x128xf32> -> vector<16x128xf32>
    %4 = vector.broadcast %2 : vector<1x128xf32> to vector<16x128xf32>
    %5 = arith.addf %3, %4 : vector<16x128xf32>
    %cst_5 = arith.constant 0.000000e+00 : f32
    %6 = vector.broadcast %cst_5 : f32 to vector<16x128xf32>
    %7 = arith.maximumf %5, %6 : vector<16x128xf32>
    %8 = arith.truncf %7 : vector<16x128xf32> to vector<16x128xbf16>
    %c0_6 = arith.constant 0 : index
    %c0_7 = arith.constant 0 : index
    %9 = vector.load %arg4[%c0_6, %c0_7] : memref<128x128xbf16, #tpu.memory_space<vmem>>, vector<128x128xbf16>
    %c0_8 = arith.constant 0 : index
    %c0_9 = arith.constant 0 : index
    %10 = vector.load %arg5[%c0_8, %c0_9] : memref<1x128xf32, #tpu.memory_space<vmem>>, vector<1x128xf32>
    %cst_10 = arith.constant dense<0.000000e+00> : vector<16x128xf32>
    %11 = tpu.matmul %8, %9, %cst_10 {dimension_numbers = #tpu.dot_dimension_numbers<[1], [0], [0], [1], [0, 0, 1, 1], [], []>} : vector<16x128xbf16>, vector<128x128xbf16>, vector<16x128xf32> -> vector<16x128xf32>
    %12 = vector.broadcast %10 : vector<1x128xf32> to vector<16x128xf32>
    %13 = arith.addf %11, %12 : vector<16x128xf32>
    %cst_11 = arith.constant 0.000000e+00 : f32
    %14 = vector.broadcast %cst_11 : f32 to vector<16x128xf32>
    %15 = arith.maximumf %13, %14 : vector<16x128xf32>
    %16 = arith.truncf %15 : vector<16x128xf32> to vector<16x128xbf16>
    %c0_12 = arith.constant 0 : index
    %c0_13 = arith.constant 0 : index
    %17 = vector.load %arg6[%c0_12, %c0_13] : memref<128x128xbf16, #tpu.memory_space<vmem>>, vector<128x128xbf16>
    %c0_14 = arith.constant 0 : index
    %c0_15 = arith.constant 0 : index
    %18 = vector.load %arg7[%c0_14, %c0_15] : memref<1x128xf32, #tpu.memory_space<vmem>>, vector<1x128xf32>
    %cst_16 = arith.constant dense<0.000000e+00> : vector<16x128xf32>
    %19 = tpu.matmul %16, %17, %cst_16 {dimension_numbers = #tpu.dot_dimension_numbers<[1], [0], [0], [1], [0, 0, 1, 1], [], []>} : vector<16x128xbf16>, vector<128x128xbf16>, vector<16x128xf32> -> vector<16x128xf32>
    %20 = vector.broadcast %18 : vector<1x128xf32> to vector<16x128xf32>
    %21 = arith.addf %19, %20 : vector<16x128xf32>
    %22 = arith.truncf %21 : vector<16x128xf32> to vector<16x128xbf16>
    %c0_17 = arith.constant 0 : index
    %c0_18 = arith.constant 0 : index
    %23 = vector.load %arg8[%c0_17, %c0_18] : memref<16x128xbf16, #tpu.memory_space<vmem>>, vector<16x128xbf16>
    tpu.vector_store %arg8[%c0_17, %c0_18], %22 {strides = array<i32>} : memref<16x128xbf16, #tpu.memory_space<vmem>>, vector<16x128xbf16>,
    return
  }
  func.func @transform_0(%arg0: i32) -> (i32, i32) {
    %c0_i32 = arith.constant 0 : i32
    %c0_i32_0 = arith.constant 0 : i32
    return %arg0, %c0_i32 : i32, i32
  }
  func.func @transform_1(%arg0: i32) -> (i32, i32) {
    %c0_i32 = arith.constant 0 : i32
    %c0_i32_0 = arith.constant 0 : i32
    %c0_i32_1 = arith.constant 0 : i32
    return %c0_i32, %c0_i32_0 : i32, i32
  }
  func.func @transform_2(%arg0: i32) -> (i32, i32) {
    %c0_i32 = arith.constant 0 : i32
    %c0_i32_0 = arith.constant 0 : i32
    %c0_i32_1 = arith.constant 0 : i32
    return %c0_i32, %c0_i32_0 : i32, i32
  }
  func.func @transform_3(%arg0: i32) -> (i32, i32) {
    %c0_i32 = arith.constant 0 : i32
    %c0_i32_0 = arith.constant 0 : i32
    %c0_i32_1 = arith.constant 0 : i32
    return %c0_i32, %c0_i32_0 : i32, i32
  }
  func.func @transform_4(%arg0: i32) -> (i32, i32) {
    %c0_i32 = arith.constant 0 : i32
    %c0_i32_0 = arith.constant 0 : i32
    %c0_i32_1 = arith.constant 0 : i32
    return %c0_i32, %c0_i32_0 : i32, i32
  }
  func.func @transform_5(%arg0: i32) -> (i32, i32) {
    %c0_i32 = arith.constant 0 : i32
    %c0_i32_0 = arith.constant 0 : i32
    %c0_i32_1 = arith.constant 0 : i32
    return %c0_i32, %c0_i32_0 : i32, i32
  }
  func.func @transform_6(%arg0: i32) -> (i32, i32) {
    %c0_i32 = arith.constant 0 : i32
    %c0_i32_0 = arith.constant 0 : i32
    %c0_i32_1 = arith.constant 0 : i32
    return %c0_i32, %c0_i32_0 : i32, i32
  }
  func.func @transform_7(%arg0: i32) -> (i32, i32) {
    %c0_i32 = arith.constant 0 : i32
    %c0_i32_0 = arith.constant 0 : i32
    return %arg0, %c0_i32 : i32, i32
  }
}

</mosaic_0001>

<bundles_post_ra>
// kernel: _forward_padded.1
= control target key start
LH: loop header
LB: loop body
LE: loop exit
PB: predicated region body
PF: predicated region fallthrough
CT: control target
= control target key end

     0   :  { %12 = vsyncpa [#allocation3], 0  ;;  %s755_s0 = inlined_call_operand.vmem [shape: bf16[16,128], index: 0, kind: input, shape index: {}]   ;;  %s756_s1 = inlined_call_operand.hbm [shape: bf16[128,128], index: 1, kind: input, shape index: {}]   ;;  %s757_s2 = inlined_call_operand.vmem [shape: f32[1,128], index: 2, kind: input, shape index: {}]   ;;  %s758_s3 = inlined_call_operand.hbm [shape: bf16[128,128], index: 3, kind: input, shape index: {}]   ;;  %s759_s4 = inlined_call_operand.vmem [shape: f32[1,128], index: 4, kind: input, shape index: {}]   ;;  %s760_s5 = inlined_call_operand.hbm [shape: bf16[128,128], index: 5, kind: input, shape index: {}]   ;;  %s761_s6 = inlined_call_operand.vmem [shape: f32[1,128], index: 6, kind: input, shape index: {}]   ;;  %s762_s7 = inlined_call_operand.vmem [shape: bf16[16,128], index: 7, kind: output, shape index: {}]  }
   0x1   :  { %13 = vsyncpa [#allocation5], 0  ;;  %s654_s24 = smov [#allocation4]   ;;  %s655_s26 = smov [#allocation2]  }
   0x2   :  { %s35_s25 = sshll.u32 %s654_s24, 4  ;;  %s21_s27 = sshll.u32 %s655_s26, 4  ;;  %s36_s25 = int_to_ptr.vmem [resolvable:$true] %s35_s25  ;;  %s22_s27 = int_to_ptr.vmem [resolvable:$true] %s21_s27 }
   0x3   :  { %s598_s28 = scalar_lea.vmem %s36_s25, 1024  ;;  %p603_p1 = scmp.lt.s32.totalorder %s36_s25, %s36_s25 }
   0x4   :  { %p599_p0 = scmp.ne.s32.totalorder %s36_s25, %s598_s28  ;;  %p604_p2 = scmp.lt.s32.totalorder %s598_s28, %s598_s28 }
   0x6   :  { %p605_p3 = por %p604_p2, %p603_p1 }
   0x8   :  { %p606_p4 = pnand %p605_p3, %p599_p0 }
   0xa   :  { %609 = shalt.err (!%p606_p4)
}
   0xb   :  { %s656_s29 = smov 64   ;;  %s657_s30 = smov 4  }
   0xc   :  { %41 = dma.hbm_to_vmem [thread:$0]  %s758_s3, 1024, %s36_s25, [#allocation5], %s656_s29, %s656_s29, %s657_s30  }
   0xd   :  { %s618_s10 = scalar_lea.vmem %s22_s27, 1024  ;;  %p623_p6 = scmp.lt.s32.totalorder %s22_s27, %s22_s27 }
   0xe   :  { %p619_p5 = scmp.ne.s32.totalorder %s22_s27, %s618_s10  ;;  %p624_p7 = scmp.lt.s32.totalorder %s618_s10, %s618_s10 }
  0x10   :  { %p625_p8 = por %p624_p7, %p623_p6 }
  0x12   :  { %p626_p9 = pnand %p625_p8, %p619_p5 }
  0x14   :  { %629 = shalt.err (!%p626_p9)
}
  0x15   :  { %27 = dma.hbm_to_vmem [thread:$0]  %s756_s1, 1024, %s22_s27, [#allocation3], %s656_s29, %s656_s29, %s657_s30  }
  0x16   :  { %s658_s13 = smov [#allocation6]  }
  0x17   :  { %s49_s14 = sshll.u32 %s658_s13, 4  ;;  %s50_s14 = int_to_ptr.vmem [resolvable:$true] %s49_s14 }
  0x18   :  { %s638_s15 = scalar_lea.vmem %s50_s14, 1024  ;;  %p643_p11 = scmp.lt.s32.totalorder %s50_s14, %s50_s14 }
  0x19   :  { %p639_p10 = scmp.ne.s32.totalorder %s50_s14, %s638_s15  ;;  %p644_p12 = scmp.lt.s32.totalorder %s638_s15, %s638_s15 }
  0x1b   :  { %p645_p13 = por %p644_p12, %p643_p11 }
  0x1d   :  { %p646_p0 = pnand %p645_p13, %p639_p10 }
  0x1f   :  { %649 = shalt.err (!%p646_p0)
}
  0x20   :  { %55 = dma.hbm_to_vmem [thread:$0]  %s760_s5, 1024, %s50_s14, [#allocation5], %s656_s29, %s656_s29, %s657_s30  }
  0x21   :  { %650 = dma.done.wait [#allocation3], 1024  }
  0x22   :  { %651 = vsyncadd [#allocation3], 4294966272 }
  0x23   :  { %652 = dma.done.wait [#allocation5], 2048  }
  0x24   :  { %653 = vsyncadd [#allocation5], 4294965248  ;;  %v659_v0 = vmov 0.0   ;;  %vm660_vm0 = vmmov 0   ;;  %v565_v1 = vld [vmem:[#allocation2 + $0x38] sm:$0xff]   ;;  %v566_v2 = vld [vmem:[#allocation2 + $0x30] sm:$0xff]  }
  0x25   :  { %498 = vmatprep.subr.bf16.mxu0 %v659_v0  ;;  %514 = vmatprep.mubr.msk.bf16.mxu0 %vm660_vm0, %v659_v0  ;;  %v567_v3 = vld [vmem:[#allocation2 + $0x28] sm:$0xff]   ;;  %v574_v4 = vld [vmem:[#allocation4 + $0x38] sm:$0xff]   ;;  %v568_v5 = vld [vmem:[#allocation2 + $0x20] sm:$0xff]  }
  0x26   :  { %518 = vmatprep.subr.bf16.mxu1 %v659_v0  ;;  %534 = vmatprep.mubr.msk.bf16.mxu1 %vm660_vm0, %v659_v0  ;;  %v575_v6 = vld [vmem:[#allocation4 + $0x30] sm:$0xff]   ;;  %v569_v7 = vld [vmem:[#allocation2 + $0x18] sm:$0xff]   ;;  %v576_v8 = vld [vmem:[#allocation4 + $0x28] sm:$0xff]  }
  0x27   :  { %499 = vmatpush3.bf16.msra.mxu0 %v565_v1  ;;  %519 = vmatpush3.bf16.msra.mxu1 %v574_v4  ;;  %v570_v9 = vld [vmem:[#allocation2 + $0x10] sm:$0xff]   ;;  %v577_v10 = vld [vmem:[#allocation4 + $0x20] sm:$0xff]   ;;  %v571_v11 = vld [vmem:[#allocation2 + $0x8] sm:$0xff]  }
  0x28   :  { %500 = vmatprep.subr.bf16.mxu0 %v659_v0  ;;  %520 = vmatprep.subr.bf16.mxu1 %v659_v0  ;;  %v578_v12 = vld [vmem:[#allocation4 + $0x18] sm:$0xff]   ;;  %v572_v13 = vld [vmem:[#allocation2] sm:$0xff]   ;;  %v579_v15 = vld [vmem:[#allocation4 + $0x10] sm:$0xff]  }
  0x29   :  { %v573_v14 = vld [vmem:[%s755_s0] sm:$0xff]   ;;  %v580_v16 = vld [vmem:[#allocation4 + $0x8] sm:$0xff]   ;;  %v582_v18 = vld [vmem:[#allocation6 + $0x38] sm:$0xff]  }
  0x2a   :  { %v581_v17 = vld [vmem:[#allocation4] sm:$0xff]   ;;  %v583_v19 = vld [vmem:[#allocation6 + $0x30] sm:$0xff]   ;;  %v584_v20 = vld [vmem:[#allocation6 + $0x28] sm:$0xff]  }
  0x2b   :  { %501 = vmatpush3.bf16.msra.mxu0 %v566_v2  ;;  %521 = vmatpush3.bf16.msra.mxu1 %v575_v6  ;;  %v585_v21 = vld [vmem:[#allocation6 + $0x20] sm:$0xff]   ;;  %v586_v22 = vld [vmem:[#allocation6 + $0x18] sm:$0xff]   ;;  %v587_v33 = vld [vmem:[#allocation6 + $0x10] sm:$0xff]  }
  0x2c   :  { %502 = vmatprep.subr.bf16.mxu0 %v659_v0  ;;  %522 = vmatprep.subr.bf16.mxu1 %v659_v0  ;;  %v434_v23 = vld [vmem:[%s757_s2] ss:$0 sm:$0xff]  ;;  %v588_v34 = vld [vmem:[#allocation6 + $0x8] sm:$0xff]  }
  0x2d   :  { %v589_v35 = vld [vmem:[#allocation6] sm:$0xff]  }
  0x2e   :  { %v444_v36 = vld [vmem:[%s759_s4] ss:$0 sm:$0xff] }
  0x2f   :  { %503 = vmatpush3.bf16.msra.mxu0 %v567_v3  ;;  %523 = vmatpush3.bf16.msra.mxu1 %v576_v8  ;;  %v453_v47 = vld [vmem:[%s761_s6] ss:$0 sm:$0xff] }
  0x30   :  { %504 = vmatprep.subr.bf16.mxu0 %v659_v0  ;;  %524 = vmatprep.subr.bf16.mxu1 %v659_v0 }
  0x33   :  { %505 = vmatpush3.bf16.msra.mxu0 %v568_v5  ;;  %525 = vmatpush3.bf16.msra.mxu1 %v577_v10 }
  0x34   :  { %506 = vmatprep.subr.bf16.mxu0 %v659_v0  ;;  %526 = vmatprep.subr.bf16.mxu1 %v659_v0 }
  0x37   :  { %507 = vmatpush3.bf16.msra.mxu0 %v569_v7  ;;  %527 = vmatpush3.bf16.msra.mxu1 %v578_v12 }
  0x38   :  { %508 = vmatprep.subr.bf16.mxu0 %v659_v0  ;;  %528 = vmatprep.subr.bf16.mxu1 %v659_v0 }
  0x3b   :  { %509 = vmatpush3.bf16.msra.mxu0 %v570_v9  ;;  %529 = vmatpush3.bf16.msra.mxu1 %v579_v15 }
  0x3c   :  { %510 = vmatprep.subr.bf16.mxu0 %v659_v0  ;;  %530 = vmatprep.subr.bf16.mxu1 %v659_v0 }
  0x3f   :  { %511 = vmatpush3.bf16.msra.mxu0 %v571_v11  ;;  %531 = vmatpush3.bf16.msra.mxu1 %v580_v16 }
  0x40   :  { %512 = vmatprep.subr.bf16.mxu0 %v659_v0  ;;  %532 = vmatprep.subr.bf16.mxu1 %v659_v0 }
  0x43   :  { %513 = vmatpush3.bf16.msra.mxu0 %v572_v13  ;;  %533 = vmatpush3.bf16.msra.mxu1 %v581_v17 }
  0x44   :  { %538 = vmatprep.subr.bf16.mxu0 %v659_v0 }
  0x46   :  { %515 = vmatmul.mubr.bf16.vlgmr.msra.gmra.mxu0 %v573_v14 }
  0x47   :  { %554 = vmatprep.mubr.msk.bf16.mxu0 %vm660_vm0, %v659_v0  ;;  %539 = vmatpush3.bf16.msra.mxu0 %v582_v18 }
  0x48   :  { %540 = vmatprep.subr.bf16.mxu0 %v659_v0 }
  0x4b   :  { %541 = vmatpush3.bf16.msra.mxu0 %v583_v19 }
  0x4c   :  { %542 = vmatprep.subr.bf16.mxu0 %v659_v0 }
  0x4f   :  { %543 = vmatpush3.bf16.msra.mxu0 %v584_v20 }
  0x50   :  { %544 = vmatprep.subr.bf16.mxu0 %v659_v0 }
  0x53   :  { %545 = vmatpush3.bf16.msra.mxu0 %v585_v21 }
  0x54   :  { %546 = vmatprep.subr.bf16.mxu0 %v659_v0 }
  0x57   :  { %547 = vmatpush3.bf16.msra.mxu0 %v586_v22 }
  0x58   :  { %548 = vmatprep.subr.bf16.mxu0 %v659_v0 }
  0x5b   :  { %549 = vmatpush3.bf16.msra.mxu0 %v587_v33 }
  0x5c   :  { %550 = vmatprep.subr.bf16.mxu0 %v659_v0 }
  0x5f   :  { %551 = vmatpush3.bf16.msra.mxu0 %v588_v34 }
  0x60   :  { %552 = vmatprep.subr.bf16.mxu0 %v659_v0 }
  0x63   :  { %553 = vmatpush3.bf16.msra.mxu0 %v589_v35 }
 0x106   :  { %v181_v24 = vpop.f32.mrf.mxu0 }
 0x107   :  { %v182_v26 = vadd.f32 %v434_v23, %v181_v24 }
 0x108   :  { %v516_v25 = vpop.f32.mrf.mxu0 }
 0x109   :  { %v188_v30 = vmax.f32 %v182_v26, 0.0 }
 0x10a   :  { %v184_v27 = vpop.f32.mrf.mxu0 }
 0x10b   :  { %v185_v28 = vadd.f32 %v434_v23, %v184_v27 }
 0x10c   :  { %v517_v29 = vpop.f32.mrf.mxu0 }
 0x10d   :  { %v189_v31 = vmax.f32 %v185_v28, 0.0 }
 0x10f   :  { %v190_v32 = vpack.c.bf16 %v189_v31, %v188_v30 }
 0x111   :  { %535 = vmatmul.mubr.bf16.vlgmr.msra.gmra.mxu1 %v190_v32 }
 0x1d1   :  { %v296_v37 = vpop.f32.mrf.mxu1 }
 0x1d2   :  { %v297_v39 = vadd.f32 %v444_v36, %v296_v37 }
 0x1d3   :  { %v536_v38 = vpop.f32.mrf.mxu1 }
 0x1d4   :  { %v303_v43 = vmax.f32 %v297_v39, 0.0 }
 0x1d5   :  { %v299_v40 = vpop.f32.mrf.mxu1 }
 0x1d6   :  { %v300_v41 = vadd.f32 %v444_v36, %v299_v40 }
 0x1d7   :  { %v537_v42 = vpop.f32.mrf.mxu1 }
 0x1d8   :  { %v304_v44 = vmax.f32 %v300_v41, 0.0 }
 0x1da   :  { %v305_v45 = vpack.c.bf16 %v304_v44, %v303_v43 }
 0x1dc   :  { %555 = vmatmul.mubr.bf16.vlgmr.msra.gmra.mxu0 %v305_v45 }
 0x29c   :  { %v411_v46 = vpop.f32.mrf.mxu0 }
 0x29d   :  { %v412_v50 = vadd.f32 %v453_v47, %v411_v46 }
 0x29e   :  { %v556_v48 = vpop.f32.mrf.mxu0 }
 0x2a0   :  { %v414_v49 = vpop.f32.mrf.mxu0 }
 0x2a1   :  { %v415_v51 = vadd.f32 %v453_v47, %v414_v49 }
 0x2a2   :  { %v557_v52 = vpop.f32.mrf.mxu0 }
 0x2a3   :  { %v469_v53 = vpack.c.bf16 %v415_v51, %v412_v50 }
 0x2a5   :  { %470 = vst [vmem:[%s762_s7] sm:$0xff] %v469_v53  }
 0x2a6   :  { %432 = vsyncpa [#allocation3], 1 }
 0x2a7   :  { %433 = vsyncpa [#allocation5], 1 }

</bundles_post_ra>
